<compile_context>
chip_gen: v7x
topology: tpu7x:2x2x1
jax: 0.10.0
libtpu: 0.0.40
codegen_flags: <defaults>
</compile_context>

<pallas_src>
import functools

import jax
import jax.numpy as jnp
from jax.experimental import pallas as pl
from jax.experimental.pallas import tpu as pltpu


def _focal_loss_kernel(*refs, gamma, n_valid, tile_p, pps, use_alpha,
                       need_mask, split_pixels):
    if use_alpha:
        x_ref, t_ref, a_ref, o_ref = refs
    else:
        x_ref, t_ref, o_ref = refs

    n = pl.program_id(1)   # batch index within this split
    j = pl.program_id(2)   # pixel-tile index within this split

    # Zero this split's accumulator row at the start of its sweep.
    @pl.when(jnp.logical_and(n == 0, j == 0))
    def _():
        o_ref[...] = jnp.zeros_like(o_ref)

    x = x_ref[0].astype(jnp.float32)     # (C, tile_p): classes on sublanes
    t = t_ref[0]                         # (1, tile_p) int32 target class ids

    # log-softmax over the class (sublane) axis, gather fused on shifted logits.
    m = jnp.max(x, axis=0, keepdims=True)                      # (1, tile_p)
    z = x - m
    lse = jnp.log(jnp.sum(jnp.exp(z), axis=0, keepdims=True))  # (1, tile_p)
    cls = jax.lax.broadcasted_iota(jnp.int32, z.shape, 0)      # (C, tile_p)
    onehot = cls == t
    z_t = jnp.sum(jnp.where(onehot, z, 0.0), axis=0, keepdims=True)
    logpt = z_t - lse                                          # (1, tile_p)
    pt = jnp.exp(logpt)

    if use_alpha:
        at = jnp.sum(jnp.where(onehot, a_ref[...], 0.0), axis=0, keepdims=True)
        logpt = logpt * at

    # Focal modulation, specialized at trace time on the static gamma.
    g = float(gamma)
    if g == 0.0:
        loss = -logpt
    else:
        omp = 1.0 - pt
        if g.is_integer() and 1.0 <= g <= 4.0:
            mod = omp
            for _ in range(int(g) - 1):
                mod = mod * omp
        else:
            mod = omp ** g
        loss = -mod * logpt                                    # (1, tile_p)

    # Mask ragged / ghost / padded lanes (only traced when needed).  The mask
    # is a select, so NaN/Inf from unspecified out-of-bounds lane contents
    # never reaches the accumulator.
    if need_mask:
        if split_pixels:
            base = (pl.program_id(0) * pps + j) * tile_p
        else:
            base = j * tile_p
        lane = jax.lax.broadcasted_iota(jnp.int32, loss.shape, 1)
        loss = jnp.where(base + lane < n_valid, loss, 0.0)

    o_ref[...] += loss[None]


def _num_tensorcores():
    """2 on v7x (2 TensorCores/chip), 1 on v5e/v6e. Safe fallback: 1."""
    try:
        kind = str(jax.devices()[0].device_kind).lower()
        if "v7" in kind or "tpu7" in kind:
            return 2
    except Exception:
        pass
    return 1


def _vmem_cap_bytes():
    """Generation-aware scoped-VMEM cap (half of physical, 16..64 MiB)."""
    try:
        phys = int(pltpu.get_tpu_info().vmem_capacity_bytes)
        return int(min(max(phys // 2, 16 * 2**20), 64 * 2**20))
    except Exception:
        return 48 * 2**20


def focal_loss(logits_nchw, target_nhw, *, gamma=0.0, alpha=None,
               size_average=True, tile_p=None, n_split=None):
    """Pallas TPU implementation of FocalLoss.forward.

    logits_nchw: (N, C, H, W) float logits (f32 or bf16).
    target_nhw : (N, H, W) integer class labels in [0, C).
    alpha      : None, a scalar a (-> [a, 1-a]), or a length-C per-class vector
                 (mirrors the PyTorch module's alpha handling).
    n_split    : optional override for the number of TensorCore splits.
    """
    N, C, H, W = logits_nchw.shape
    P = H * W
    M = N * P

    # NCHW -> (N, C, H*W): pure reshape (no transpose, no extra HBM pass).
    x = logits_nchw.reshape(N, C, P)
    t = target_nhw.reshape(N, 1, P).astype(jnp.int32)

    # Mirror the torch module's alpha normalization.
    if isinstance(alpha, (int, float)) and not isinstance(alpha, bool):
        alpha = [float(alpha), 1.0 - float(alpha)]
    use_alpha = alpha is not None

    # Tiny-spatial corner case: keep the lane dim >= 128 so blocks never exceed
    # the array width (pad cost is negligible at this size).
    P_arr = P
    if P < 128:
        x = jnp.pad(x, ((0, 0), (0, 0), (0, 128 - P)))
        t = jnp.pad(t, ((0, 0), (0, 0), (0, 128 - P)))
        P_arr = 128

    c_pad = pl.cdiv(C, 8) * 8
    x_bpe = jnp.dtype(x.dtype).itemsize
    # Double-buffered logits + double-buffered (sublane-padded) targets +
    # resident accumulator row, per pixel lane.
    bytes_per_pixel = 2 * c_pad * x_bpe + 2 * 8 * 4 + 8 * 4
    vmem_cap = _vmem_cap_bytes()

    # Tile sizing: ~4 MiB of logits per block, lane-aligned, bounded by VMEM.
    p_floor = (P_arr // 128) * 128
    if tile_p is None:
        tile_p = (1_048_576 // c_pad) // 128 * 128
        tile_p = min(tile_p, 131072)
        tile_p = min(tile_p, (vmem_cap * 6 // 10) // bytes_per_pixel // 128 * 128)
    tile_p = int(max(128, min(pl.cdiv(int(tile_p), 128) * 128, p_floor)))

    n_ptiles = pl.cdiv(P_arr, tile_p)

    # Choose the cross-core split (leading "parallel" grid axis).
    num_tc = int(n_split) if n_split is not None else _num_tensorcores()
    if num_tc >= 2 and n_ptiles >= 2 and n_ptiles % 2 == 0:
        ns, split_pixels = 2, True          # clean pixel split
    elif num_tc >= 2 and N >= 2 and N % 2 == 0:
        ns, split_pixels = 2, False         # batch split (small images)
    elif num_tc >= 2 and n_ptiles >= 2:
        ns, split_pixels = 2, True          # pixel split with one ghost tile
    else:
        ns, split_pixels = 1, True

    if split_pixels:
        pps = pl.cdiv(n_ptiles, ns)
        n_per = N
    else:
        pps = n_ptiles
        n_per = N // ns

    need_mask = (P_arr % tile_p != 0) or (P_arr != P) or \
                (split_pixels and (n_ptiles % ns) != 0)

    # Block-index maps (no HBM padding: ghost tiles are clamped to the last
    # real block and fully zeroed by the in-kernel logical-position mask).
    last_blk = n_ptiles - 1
    if split_pixels:
        if n_ptiles % ns == 0:
            def pix_blk(c, n, j, _pps=pps):
                return c * _pps + j
        else:
            def pix_blk(c, n, j, _pps=pps, _last=last_blk):
                return jnp.minimum(c * _pps + j, _last)

        def bat_blk(c, n, j):
            return n
    else:
        def pix_blk(c, n, j):
            return j

        def bat_blk(c, n, j, _np=n_per):
            return c * _np + n

    in_specs = [
        pl.BlockSpec((1, C, tile_p),
                     lambda c, n, j: (bat_blk(c, n, j), 0, pix_blk(c, n, j))),
        pl.BlockSpec((1, 1, tile_p),
                     lambda c, n, j: (bat_blk(c, n, j), 0, pix_blk(c, n, j))),
    ]
    args = [x, t]
    if use_alpha:
        alpha_arr = jnp.asarray(alpha, dtype=jnp.float32).reshape(C, 1)
        in_specs.append(pl.BlockSpec((C, 1), lambda c, n, j: (0, 0)))
        args.append(alpha_arr)

    kernel = functools.partial(
        _focal_loss_kernel,
        gamma=float(gamma), n_valid=int(P), tile_p=int(tile_p), pps=int(pps),
        use_alpha=use_alpha, need_mask=bool(need_mask),
        split_pixels=bool(split_pixels),
    )

    est = (2 * c_pad * tile_p * x_bpe   # logits blocks, double-buffered
           + 2 * 8 * tile_p * 4         # target blocks, double-buffered
           + 8 * tile_p * 4             # resident accumulator row
           + 8 * 128 * 4)               # alpha
    vmem_limit = int(min(max(2 * est, 16 * 2**20), vmem_cap))

    partials = pl.pallas_call(
        kernel,
        out_shape=jax.ShapeDtypeStruct((ns, 1, tile_p), jnp.float32),
        grid_spec=pltpu.PrefetchScalarGridSpec(
            num_scalar_prefetch=0,
            grid=(ns, n_per, pps),
            in_specs=in_specs,
            out_specs=pl.BlockSpec((1, 1, tile_p), lambda c, n, j: (c, 0, 0)),
        ),
        compiler_params=pltpu.CompilerParams(
            dimension_semantics=("parallel", "arbitrary", "arbitrary"),
            vmem_limit_bytes=vmem_limit,
        ),
    )(*args)

    total = jnp.sum(partials)
    if size_average:
        return total / jnp.float32(M)
    return total


def _focal_loss_ref(logits_nchw, target_nhw, *, gamma, alpha, size_average):
    """Pure-JAX reference mirroring the PyTorch forward exactly."""
    N, C, H, W = logits_nchw.shape
    x = jnp.transpose(logits_nchw, (0, 2, 3, 1)).reshape(-1, C)
    t = target_nhw.reshape(-1).astype(jnp.int32)
    logp = jax.nn.log_softmax(x, axis=1)
    logpt = jnp.take_along_axis(logp, t[:, None], axis=1)[:, 0]
    pt = jnp.exp(logpt)
    if isinstance(alpha, (int, float)) and not isinstance(alpha, bool):
        alpha = [float(alpha), 1.0 - float(alpha)]
    if alpha is not None:
        at = jnp.asarray(alpha, dtype=jnp.float32)[t]
        logpt = logpt * at
    loss = -1.0 * (1.0 - pt) ** gamma * logpt
    return loss.mean() if size_average else loss.sum()


def _check(out, ref, name):
    assert jnp.allclose(out, ref, rtol=5e-5, atol=1e-4), (name, out, ref)


if __name__ == "__main__":
    key = jax.random.PRNGKey(0)
    k1, k2, k3, k4, k5, k6, k7, k8 = jax.random.split(key, 8)

    # Config 1: gamma=2, per-class alpha, mean reduction, auto tiling/split.
    N, C, H, W = 2, 4, 16, 16
    logits = jax.random.normal(k1, (N, C, H, W), dtype=jnp.float32)
    target = jax.random.randint(k2, (N, H, W), 0, C, dtype=jnp.int32)
    alpha = [0.1, 0.2, 0.3, 0.4]
    out = jax.block_until_ready(
        focal_loss(logits, target, gamma=2.0, alpha=alpha, size_average=True))
    _check(out, _focal_loss_ref(logits, target, gamma=2.0, alpha=alpha,
                                size_average=True), "cfg1")

    # Config 2: default module config (gamma=0, alpha=None), no alpha DMA.
    out2 = jax.block_until_ready(
        focal_loss(logits, target, gamma=0.0, alpha=None, size_average=True))
    _check(out2, _focal_loss_ref(logits, target, gamma=0.0, alpha=None,
                                 size_average=True), "cfg2")

    # Config 3: unaligned H*W (ragged last block, no HBM pad), 2-way pixel
    # split forced, sum reduction.
    H3, W3 = 10, 13
    logits3 = jax.random.normal(k3, (N, C, H3, W3), dtype=jnp.float32)
    target3 = jax.random.randint(k4, (N, H3, W3), 0, C, dtype=jnp.int32)
    out3 = jax.block_until_ready(
        focal_loss(logits3, target3, gamma=2.0, alpha=alpha,
                   size_average=False, tile_p=128, n_split=2))
    _check(out3, _focal_loss_ref(logits3, target3, gamma=2.0, alpha=alpha,
                                 size_average=False), "cfg3")

    # Config 4: odd pixel-tile count with forced 2-way pixel split (ghost tile
    # clamped + masked), non-integer gamma, N=1, C=3, sum reduction.
    N4, C4, H4, W4 = 1, 3, 11, 34
    logits4 = jax.random.normal(k5, (N4, C4, H4, W4), dtype=jnp.float32)
    target4 = jax.random.randint(k6, (N4, H4, W4), 0, C4, dtype=jnp.int32)
    out4 = jax.block_until_ready(
        focal_loss(logits4, target4, gamma=1.5, alpha=None,
                   size_average=False, tile_p=128, n_split=2))
    _check(out4, _focal_loss_ref(logits4, target4, gamma=1.5, alpha=None,
                                 size_average=False), "cfg4")

    # Config 5: single pixel tile per batch, forced 2-way split -> batch split.
    out5 = jax.block_until_ready(
        focal_loss(logits, target, gamma=2.0, alpha=alpha, size_average=True,
                   n_split=2))
    _check(out5, _focal_loss_ref(logits, target, gamma=2.0, alpha=alpha,
                                 size_average=True), "cfg5")

    # Config 6: tiny spatial (P < 128) padded-lane corner case, C=5.
    N6, C6, H6, W6 = 2, 5, 6, 6
    logits6 = jax.random.normal(k7, (N6, C6, H6, W6), dtype=jnp.float32)
    target6 = jax.random.randint(k8, (N6, H6, W6), 0, C6, dtype=jnp.int32)
    out6 = jax.block_until_ready(
        focal_loss(logits6, target6, gamma=0.0, alpha=None, size_average=True))
    _check(out6, _focal_loss_ref(logits6, target6, gamma=0.0, alpha=None,
                                 size_average=True), "cfg6")

    print("KERNEL_OK")
</pallas_src>

<mosaic_0001>
module attributes {stable_mosaic.version = 11 : i64} {
  func.func @_focal_loss_kernel(%arg0: i32, %arg1: i32, %arg2: i32, %arg3: memref<1x4x256xf32, #tpu.memory_space<vmem>>, %arg4: memref<1x1x256xi32, #tpu.memory_space<vmem>>, %arg5: memref<4x1xf32, #tpu.memory_space<vmem>>, %arg6: memref<1x1x256xf32, #tpu.memory_space<vmem>>) attributes {dimension_semantics = [#tpu.dimension_semantics<parallel>, #tpu.dimension_semantics<arbitrary>, #tpu.dimension_semantics<arbitrary>], iteration_bounds = array<i64: 1, 2, 1>, scalar_prefetch = 0 : i64, scratch_operands = 0 : i64, tpu.core_type = #tpu.core_type<tc>, window_params = [{transform_indices = @transform_0, window_bounds = array<i64: 1, 4, 256>}, {transform_indices = @transform_1, window_bounds = array<i64: 1, 1, 256>}, {pipeline_mode = #tpu.pipeline_mode<synchronous>, transform_indices = @transform_2, window_bounds = array<i64: 4, 1>}, {transform_indices = @transform_3, window_bounds = array<i64: 1, 1, 256>}]} {
    %c0_i32 = arith.constant 0 : i32
    %0 = arith.cmpi eq, %arg1, %c0_i32 : i32
    %c0_i32_0 = arith.constant 0 : i32
    %1 = arith.cmpi eq, %arg2, %c0_i32_0 : i32
    %2 = arith.andi %0, %1 : i1
    %3 = arith.extui %2 : i1 to i32
    %c0_i32_1 = arith.constant 0 : i32
    %4 = arith.cmpi ne, %3, %c0_i32_1 : i32
    scf.if %4 {
      %cst_22 = arith.constant 0.000000e+00 : f32
      %44 = vector.broadcast %cst_22 : f32 to vector<1x1x256xf32>
      %c0_23 = arith.constant 0 : index
      %c0_24 = arith.constant 0 : index
      %c0_25 = arith.constant 0 : index
      %45 = vector.load %arg6[%c0_23, %c0_24, %c0_25] : memref<1x1x256xf32, #tpu.memory_space<vmem>>, vector<1x1x256xf32>
      tpu.vector_store %arg6[%c0_23, %c0_24, %c0_25], %44 {strides = array<i32>} : memref<1x1x256xf32, #tpu.memory_space<vmem>>, vector<1x1x256xf32>,
    } else {
    }
    %c0 = arith.constant 0 : index
    %c0_2 = arith.constant 0 : index
    %c0_3 = arith.constant 0 : index
    %5 = vector.load %arg3[%c0, %c0_2, %c0_3] : memref<1x4x256xf32, #tpu.memory_space<vmem>>, vector<1x4x256xf32>
    %6 = vector.shape_cast %5 : vector<1x4x256xf32> to vector<4x256xf32>
    %c0_4 = arith.constant 0 : index
    %c0_5 = arith.constant 0 : index
    %c0_6 = arith.constant 0 : index
    %7 = vector.load %arg4[%c0_4, %c0_5, %c0_6] : memref<1x1x256xi32, #tpu.memory_space<vmem>>, vector<1x1x256xi32>
    %8 = vector.shape_cast %7 : vector<1x1x256xi32> to vector<1x256xi32>
    %cst = arith.constant dense<0xFF800000> : vector<256xf32>
    %9 = vector.multi_reduction <maximumf>, %6, %cst [0] : vector<4x256xf32> to vector<256xf32>
    %10 = vector.shape_cast %9 : vector<256xf32> to vector<1x256xf32>
    %11 = vector.broadcast %10 : vector<1x256xf32> to vector<4x256xf32>
    %12 = arith.subf %6, %11 : vector<4x256xf32>
    %13 = math.exp %12 : vector<4x256xf32>
    %cst_7 = arith.constant dense<0.000000e+00> : vector<256xf32>
    %14 = vector.multi_reduction <add>, %13, %cst_7 [0] : vector<4x256xf32> to vector<256xf32>
    %15 = vector.shape_cast %14 : vector<256xf32> to vector<1x256xf32>
    %16 = math.log %15 : vector<1x256xf32>
    %17 = tpu.iota {dimensions = array<i32: 0>} : vector<4x256xi32>
    %18 = vector.broadcast %8 : vector<1x256xi32> to vector<4x256xi32>
    %19 = arith.cmpi eq, %17, %18 : vector<4x256xi32>
    %cst_8 = arith.constant 0.000000e+00 : f32
    %20 = vector.broadcast %cst_8 : f32 to vector<4x256xf32>
    %21 = arith.select %19, %12, %20 : vector<4x256xi1>, vector<4x256xf32>
    %cst_9 = arith.constant dense<0.000000e+00> : vector<256xf32>
    %22 = vector.multi_reduction <add>, %21, %cst_9 [0] : vector<4x256xf32> to vector<256xf32>
    %23 = vector.shape_cast %22 : vector<256xf32> to vector<1x256xf32>
    %24 = arith.subf %23, %16 : vector<1x256xf32>
    %25 = math.exp %24 : vector<1x256xf32>
    %c0_10 = arith.constant 0 : index
    %c0_11 = arith.constant 0 : index
    %26 = vector.load %arg5[%c0_10, %c0_11] : memref<4x1xf32, #tpu.memory_space<vmem>>, vector<4x1xf32>
    %cst_12 = arith.constant 0.000000e+00 : f32
    %27 = vector.shape_cast %26 : vector<4x1xf32> to vector<4x1xf32>
    %28 = vector.broadcast %27 : vector<4x1xf32> to vector<4x256xf32>
    %29 = vector.broadcast %cst_12 : f32 to vector<4x256xf32>
    %30 = arith.select %19, %28, %29 : vector<4x256xi1>, vector<4x256xf32>
    %cst_13 = arith.constant dense<0.000000e+00> : vector<256xf32>
    %31 = vector.multi_reduction <add>, %30, %cst_13 [0] : vector<4x256xf32> to vector<256xf32>
    %32 = vector.shape_cast %31 : vector<256xf32> to vector<1x256xf32>
    %33 = arith.mulf %24, %32 : vector<1x256xf32>
    %cst_14 = arith.constant 1.000000e+00 : f32
    %34 = vector.broadcast %cst_14 : f32 to vector<1x256xf32>
    %35 = arith.subf %34, %25 : vector<1x256xf32>
    %36 = arith.mulf %35, %35 : vector<1x256xf32>
    %cst_15 = arith.constant 0.000000e+00 : f32
    %37 = vector.broadcast %cst_15 : f32 to vector<1x256xf32>
    %38 = arith.subf %37, %36 : vector<1x256xf32>
    %39 = arith.mulf %38, %33 : vector<1x256xf32>
    %c0_16 = arith.constant 0 : index
    %c0_17 = arith.constant 0 : index
    %c0_18 = arith.constant 0 : index
    %40 = vector.load %arg6[%c0_16, %c0_17, %c0_18] : memref<1x1x256xf32, #tpu.memory_space<vmem>>, vector<1x1x256xf32>
    %41 = vector.shape_cast %39 : vector<1x256xf32> to vector<1x1x256xf32>
    %42 = arith.addf %40, %41 : vector<1x1x256xf32>
    %c0_19 = arith.constant 0 : index
    %c0_20 = arith.constant 0 : index
    %c0_21 = arith.constant 0 : index
    %43 = vector.load %arg6[%c0_19, %c0_20, %c0_21] : memref<1x1x256xf32, #tpu.memory_space<vmem>>, vector<1x1x256xf32>
    tpu.vector_store %arg6[%c0_19, %c0_20, %c0_21], %42 {strides = array<i32>} : memref<1x1x256xf32, #tpu.memory_space<vmem>>, vector<1x1x256xf32>,
    return
  }
  func.func @transform_0(%arg0: i32, %arg1: i32, %arg2: i32) -> (i32, i32, i32) {
    %c1_i32 = arith.constant 1 : i32
    %0 = arith.muli %arg0, %c1_i32 : i32
    %1 = arith.addi %0, %arg2 : i32
    %c0_i32 = arith.constant 0 : i32
    %c0_i32_0 = arith.constant 0 : i32
    return %arg1, %c0_i32, %1 : i32, i32, i32
  }
  func.func @transform_1(%arg0: i32, %arg1: i32, %arg2: i32) -> (i32, i32, i32) {
    %c1_i32 = arith.constant 1 : i32
    %0 = arith.muli %arg0, %c1_i32 : i32
    %1 = arith.addi %0, %arg2 : i32
    %c0_i32 = arith.constant 0 : i32
    %c0_i32_0 = arith.constant 0 : i32
    return %arg1, %c0_i32, %1 : i32, i32, i32
  }
  func.func @transform_2(%arg0: i32, %arg1: i32, %arg2: i32) -> (i32, i32) {
    %c0_i32 = arith.constant 0 : i32
    %c0_i32_0 = arith.constant 0 : i32
    %c0_i32_1 = arith.constant 0 : i32
    return %c0_i32, %c0_i32_0 : i32, i32
  }
  func.func @transform_3(%arg0: i32, %arg1: i32, %arg2: i32) -> (i32, i32, i32) {
    %c0_i32 = arith.constant 0 : i32
    %c0_i32_0 = arith.constant 0 : i32
    %c0_i32_1 = arith.constant 0 : i32
    return %arg0, %c0_i32, %c0_i32_0 : i32, i32, i32
  }
}

</mosaic_0001>

<bundles_post_ra>
// kernel: tpu_custom_call.1
= control target key start
LH: loop header
LB: loop body
LE: loop exit
PB: predicated region body
PF: predicated region fallthrough
CT: control target
= control target key end

     0   :  { %8 = vsyncpa [#allocation3], 0  ;;  %s911_s0 = inlined_call_operand.hbm [shape: f32[2,4,256], index: 0, kind: input, shape index: {}]   ;;  %s912_s1 = inlined_call_operand.vmem [shape: s32[2,1,256], index: 1, kind: input, shape index: {}]   ;;  %s913_s2 = inlined_call_operand.vmem [shape: f32[4,1], index: 2, kind: input, shape index: {}]   ;;  %s914_s3 = inlined_call_operand.hbm [shape: f32[1,1,256], index: 3, kind: output, shape index: {}]  }
   0x1   :  { %10 = vsyncpa [#allocation3 + $0x1], 0 }
   0x2   :  { %11 = vsyncpa [#allocation4], 0  ;;  %s724_s12 = smov 0   ;;  %s726_s13 = smov 0  }
   0x3   :  { %s728_s14 = smov 0   ;;  %s730_s15 = smov 0  }
   0x4   :  { %s732_s16 = smov 0   ;;  %s734_s17 = smov 0  }
   0x5 LB: > { %s494_s18 = sadd.s32 4294967295, %s697_s17   ;;  %s32_s19 = sadd.s32 1, %s693_s16  ;;  %s697_s17 = sphi %s734_s17, %s17_s17   ;;  %s693_s16 = sphi %s732_s16, %s925_s16   ;;  %s689_s15 = sphi %s730_s15, %s924_s15   ;;  %s685_s14 = sphi %s728_s14, %s923_s14   ;;  %s681_s13 = sphi %s726_s13, %s922_s13   ;;  %s677_s12 = sphi %s724_s12, %s921_s12  }
   0x6   : > { %p34_p0 = scmp.ge.s32.totalorder %s32_s19, 2  ;;  %s47_s20 = sadd.s32 1, %s685_s14 }
   0x7   : > { %p54_p1 = scmp.ne.s32.totalorder %s685_s14, %s681_s13  ;;  %p55_p2 = scmp.eq.s32.totalorder %s697_s17, 0 }
   0x8   : > { %s927_s19 = smov (%p34_p0, %s32_s19), 0  ;;  %p60_p4 = scmp.ne.s32.totalorder %s681_s13, %s677_s12 }
   0x9   : > { %p760_p3 = por %p55_p2, %p54_p1  ;;  %s42_s22 = ssub.s32 %s693_s16, %s927_s19 }
   0xa   : > { %p61_p5 = scmp.eq.s32.totalorder %s494_s18, 0  ;;  %p45_p6 = scmp.eq.s32.totalorder %s42_s22, 0 }
   0xb   : > { %p520_p8 = scmp.lt.s32.totalorder %s697_s17, 2  ;;  %s164_s25 = sand.u32 1, %s685_s14  }
   0xc   : > { %p769_p7 = por %p61_p5, %p60_p4  ;;  %s508_s26 = sshll.u32 %s693_s16, 7 }
   0xd   : > { %s775_s24 = scalar_select %p45_p6, %s685_s14, %s47_s20  }
   0xe   : > { %s497_s27 = sshll.u32 %s164_s25, 3  ;;  %s782_s30 = scalar_lea.hbm %s911_s0, %s508_s26 }
   0xf   : > { %s168_s4 = scalar_lea.vmem [#allocation2], %s497_s27  ;;  %p786_p9 = pnand %p520_p8, %p760_p3 }
  0x10   : > { %s179_s5 = sshll.u32 %s168_s4, 4  ;;  %s165_s7 = scalar_lea.sflag [#allocation3], %s164_s25  ;;  %s790_s5 = int_to_ptr.vmem [resolvable:$true] %s179_s5 }
  0x11   : > { %s587_s8 = scalar_lea.hbm %s782_s30, 128  ;;  %p589_p13 = pneg %p786_p9 }
  0x12   : > { %p588_p12 = scmp.ne.s32.totalorder %s782_s30, %s587_s8  ;;  %s592_s11 = scalar_lea.hbm %s911_s0, 256 }
  0x13   : > { %p593_p2 = scmp.lt.u32.totalorder %s782_s30, %s911_s0  ;;  %p594_p3 = scmp.lt.u32.totalorder %s592_s11, %s587_s8 }
  0x14   : > { %p590_p0 = pnand %p589_p13, %p588_p12  ;;  %p596_p5 = scmp.lt.u32.totalorder %s587_s8, %s782_s30 }
  0x15   : > { %p595_p4 = por %p594_p3, %p593_p2 }
  0x16   : > { %p591_p1 = pneg %p590_p0 }
  0x17   : > { %p597_p6 = por %p596_p5, %p595_p4 }
  0x19   : > { %p598_p8 = pnand %p597_p6, %p591_p1 }
  0x1b   : > { %601 = shalt.err (!%p598_p8)
}
  0x1c   : > { %s602_s21 = scalar_lea.vmem %s790_s5, 128  ;;  %s699_s22 = smov [#allocation2]  }
  0x1d   : > { %p603_p12 = scmp.ne.s32.totalorder %s790_s5, %s602_s21  ;;  %s607_s25 = sshll.u32 %s699_s22, 4  ;;  %s608_s25 = int_to_ptr.vmem [resolvable:$false] %s607_s25 }
  0x1e   : > { %s609_s26 = scalar_lea.vmem %s608_s25, 256  ;;  %p610_p11 = scmp.lt.s32.totalorder %s790_s5, %s608_s25 }
  0x1f   : > { %p605_p0 = pnand %p603_p12, %p589_p13  ;;  %p611_p2 = scmp.lt.s32.totalorder %s609_s26, %s602_s21 }
  0x21   : > { %p606_p10 = pneg %p605_p0  ;;  %p612_p3 = por %p611_p2, %p610_p11 }
  0x23   : > { %p613_p4 = pnand %p612_p3, %p606_p10 }
  0x25   : > { %616 = shalt.err (!%p613_p4)
}
  0x26   : > { %519 = dma.hbm_to_vmem [thread:$0]  (!%p786_p9), %s782_s30, 128, %s790_s5, %s165_s7  }
  0x27   : > { %p918_p1 = scmp.lt.s32.totalorder %s697_s17, 3  ;;  %p919_p5 = scmp.ge.s32.totalorder %s697_s17, 1 }
  0x29   : > { %p199_p13 = pnand %p919_p5, %p918_p1 }
  0x2a   : > { %s204_s27 = sand.u32 (!%p199_p13), 1, %s681_s13  }
  0x2b   : > { %202 = sbr.rel (%p199_p13) target bundleno = 231 (0xe7), region = 32  ;;  %s501_s28 = sshll.u32 (!%p199_p13), %s204_s27, 3 }
  0x2c   : > { %s205_s29 = scalar_lea.sflag (!%p199_p13), [#allocation3], %s204_s27  ;;  %s208_s4 = scalar_lea.vmem (!%p199_p13), [#allocation2], %s501_s28 }
  0x32   : > { %668 = dma.done.wait (%p769_p7), %s205_s29, 128  }
  0x33   : > { %670 = vsyncadd (%p769_p7), %s205_s29, 4294967168  ;;  %p239_p10 = scmp.lt.s32.totalorder %s689_s15, 1  ;;  %p248_p9 = scmp.eq.s32.totalorder %s689_s15, 0 }
  0x34   : > { %v254_v0 = vlaneseq (%p248_p9)  ;;  %v700_v1 = vmov (%p248_p9), 0.0  }
  0x35   : > { %s929_s15 = smov (!%p239_p10, %s689_s15), 1  ;;  %253 = sbr.rel (!%p248_p9) target bundleno = 60 (0x3c), region = 40 }
  0x36   : > { %s502_s30 = sshll.u32 %s929_s15, 1  ;;  %vm256_vm0 = vcmp.lt.s32.totalorder (%p248_p9), %v254_v0, 256 }
  0x37   : > { %s834_s7 = scalar_lea.vmem %s912_s1, %s502_s30  ;;  %258 = vst.msk [vmem:[#allocation5] sm:$0x3] (%p248_p9), %vm256_vm0, %v700_v1 }
  0x3c PF: > { %v344_v2 = vld [vmem:[%s913_s2] sm:$0xf]  ;;  %v701_v3 = vmov 0   ;;  %vm264_vm1 = vcmask 1043456   ;;  %v307_v24 = vlaneseq  ;;  %s703_s15 = smov [#allocation5]   ;;  %p867_p7 = scmp.eq.s32.totalorder %s494_s18, 1 }
  0x3d   : > { %575 = vset.pattern.permute.xlu0 %v701_v3  ;;  %v259_v4 = vld [vmem:[%s208_s4] sm:$0xff]  ;;  %s411_s9 = sshll.u32 %s703_s15, 4  ;;  %s412_s9 = int_to_ptr.vmem [resolvable:$true] %s411_s9 }
  0x3e   : > { %347 = vperm.xlu0 %575, %v344_v2   ;;  %v262_v5 = vcombine.high %v259_v4, %v259_v4  ;;  %v265_v6 = vsel %vm264_vm1, %v259_v4, -inf  ;;  %v842_v26 = vshrl.u32 %v307_v24, 7  ;;  %v260_v31 = vld [vmem:[%s834_s7] sm:$0x3]  ;;  %vm398_vm4 = vcmp.lt.s32.totalorder %v307_v24, 256  ;;  %s617_s11 = scalar_lea.vmem %s412_s9, 32  ;;  %p624_p12 = scmp.lt.s32.totalorder %s412_s9, %s412_s9 }
  0x3f   : > { %v266_v8 = vrot.slane %v265_v6, 4  ;;  %p618_p11 = scmp.ne.s32.totalorder %s412_s9, %s617_s11  ;;  %p625_p0 = scmp.lt.s32.totalorder %s617_s11, %s617_s11 }
  0x40   : > { %v272_v7 = vsel %vm264_vm1, %v262_v5, -inf  ;;  %v311_v30 = vsub.s32 0, %v842_v26  ;;  %v315_v33 = vsub.s32 1, %v842_v26 }
  0x41   : > { %v273_v9 = vrot.slane %v272_v7, 4  ;;  %v267_v10 = vmax.f32 %v265_v6, %v266_v8  ;;  %p619_p6 = pnand %p618_p11, %p867_p7  ;;  %p626_p2 = por %p625_p0, %p624_p12 }
  0x42   : > { %v312_v35 = vrot.slane %v260_v31, %v311_v30  ;;  %v316_v37 = vrot.slane %v260_v31, %v315_v33 }
  0x43   : > { %v274_v11 = vmax.f32 %v272_v7, %v273_v9  ;;  %v268_v12 = vrot.slane %v267_v10, 2  ;;  %p620_p8 = pneg %p619_p6 }
  0x44   : > { %vm317_vm2 = vcmp.eq.s32.totalorder %v842_v26, %v312_v35  ;;  %vm318_vm3 = vcmp.eq.s32.totalorder %v842_v26, %v316_v37 }
  0x45   : > { %v275_v13 = vrot.slane %v274_v11, 2  ;;  %v269_v14 = vmax.f32 %v267_v10, %v268_v12  ;;  %p627_p3 = pnand %p626_p2, %p620_p8 }
  0x47   : > { %v276_v15 = vmax.f32 %v274_v11, %v275_v13  ;;  %v270_v16 = vrot.slane %v269_v14, 1 }
  0x49   : > { %v277_v17 = vrot.slane %v276_v15, 1  ;;  %v271_v18 = vmax.f32 %v269_v14, %v270_v16 }
  0x4b   : > { %v278_v19 = vmax.f32 %v276_v15, %v277_v17 }
  0x4d   : > { %v281_v20 = vcombine.low %v271_v18, %v278_v19 }
  0x4f   : > { %v283_v21 = vsub.f32 %v259_v4, %v281_v20 }
  0x51   : > { %v284_v22 = vmul.f32 1.442695, %v283_v21  ;;  %v320_v39 = vcombine.high %v283_v21, %v283_v21  ;;  %v322_v41 = vsel %vm317_vm2, %v283_v21, 0.0 }
  0x52   : > { %v324_v45 = vsel %vm264_vm1, %v322_v41, 0.0 }
  0x53   : > { %577 = vpow2.f32 %v284_v22  ;;  %v323_v43 = vsel %vm318_vm3, %v320_v39, 0.0  ;;  %v325_v49 = vrot.slane %v324_v45, 4  ;;  %v702_v22 = vmov 1966171168  }
  0x54   : > { %v331_v46 = vsel %vm264_vm1, %v323_v43, 0.0 }
  0x55   : > { %v332_v50 = vrot.slane %v331_v46, 4  ;;  %v326_v53 = vadd.f32 %v325_v49, %v324_v45 }
  0x57   : > { %v333_v54 = vadd.f32 %v332_v50, %v331_v46  ;;  %v327_v55 = vrot.slane %v326_v53, 2 }
  0x59   : > { %v334_v56 = vrot.slane %v333_v54, 2  ;;  %v328_v57 = vadd.f32 %v327_v55, %v326_v53 }
  0x5b   : > { %v335_v58 = vadd.f32 %v334_v56, %v333_v54  ;;  %v329_v59 = vrot.slane %v328_v57, 1 }
  0x5d   : > { %v578_v23 = vpop.eup %577  ;;  %v336_v61 = vrot.slane %v335_v58, 1  ;;  %v330_v0 = vadd.f32 %v329_v59, %v328_v57 }
  0x5e   : > { %v287_v25 = vcombine.high %v578_v23, %v578_v23  ;;  %v289_v27 = vsel %vm264_vm1, %v578_v23, 0.0  ;;  %v381_v23 = vunpack.c.l.s4 %v702_v22 }
  0x5f   : > { %v290_v29 = vrot.slane %v289_v27, 4  ;;  %v337_v2 = vadd.f32 %v336_v61, %v335_v58 }
  0x60   : > { %v296_v28 = vsel %vm264_vm1, %v287_v25, 0.0 }
  0x61   : > { %v297_v32 = vrot.slane %v296_v28, 4  ;;  %v291_v34 = vadd.f32 %v290_v29, %v289_v27 }
  0x63   : > { %v298_v36 = vadd.f32 %v297_v32, %v296_v28  ;;  %v292_v38 = vrot.slane %v291_v34, 2  ;;  %v382_v32 = vunpack.c.0.s8 %v381_v23 }
  0x65   : > { %v299_v40 = vrot.slane %v298_v36, 2  ;;  %v293_v42 = vadd.f32 %v292_v38, %v291_v34  ;;  %v385_v41 = vsub.s32 %v382_v32, %v842_v26 }
  0x67   : > { %v300_v44 = vadd.f32 %v299_v40, %v298_v36  ;;  %v294_v47 = vrot.slane %v293_v42, 1 }
  0x69   : > { %v301_v48 = vrot.slane %v300_v44, 1  ;;  %v295_v51 = vadd.f32 %v294_v47, %v293_v42 }
  0x6b   : > { %v302_v52 = vadd.f32 %v301_v48, %v300_v44  ;;  %579 = vlog2.f32 %v295_v51  ;;  %v376_v44 = vld [vmem:[#allocation5] sm:$0x3] }
  0x6d   : > { %581 = vlog2.f32 %v302_v52 }
  0x75   : > { %v580_v60 = vpop.eup %579 }
  0x76   : > { %v304_v63 = vmul.f32 0.6931472, %v580_v60 }
  0x77   : > { %v582_v62 = vpop.eup %581 }
  0x78   : > { %v306_v1 = vmul.f32 0.6931472, %v582_v62  ;;  %v338_v3 = vsub.f32 %v330_v0, %v304_v63 }
  0x7a   : > { %v339_v4 = vsub.f32 %v337_v2, %v306_v1  ;;  %v340_v5 = vmul.f32 1.442695, %v338_v3 }
  0x7c   : > { %v342_v6 = vmul.f32 1.442695, %v339_v4  ;;  %583 = vpow2.f32 %v340_v5 }
  0x7e   : > { %585 = vpow2.f32 %v342_v6 }
  0x86   : > { %v584_v8 = vpop.eup %583 }
  0x87   : > { %v368_v18 = vsub.f32 1.0, %v584_v8 }
  0x88   : > { %v586_v11 = vpop.eup %585 }
  0x89   : > { %v369_v19 = vsub.f32 1.0, %v586_v11  ;;  %v370_v28 = vmul.f32 %v368_v18, %v368_v18 }
  0x8b   : > { %v371_v29 = vmul.f32 %v369_v19, %v369_v19  ;;  %v372_v35 = vsub.f32 0.0, %v370_v28 }
  0x8d   : > { %v373_v36 = vsub.f32 0.0, %v371_v29 }
  0xbd   : > { %v348_v7 = vpop.permute.xlu0 %347 }
  0xbe   : > { %v350_v9 = vsel %vm317_vm2, %v348_v7, 0.0  ;;  %v351_v10 = vsel %vm318_vm3, %v348_v7, 0.0 }
  0xbf   : > { %v352_v12 = vsel %vm264_vm1, %v350_v9, 0.0  ;;  %v359_v13 = vsel %vm264_vm1, %v351_v10, 0.0 }
  0xc0   : > { %v353_v14 = vrot.slane %v352_v12, 4  ;;  %v360_v15 = vrot.slane %v359_v13, 4 }
  0xc2   : > { %v354_v16 = vadd.f32 %v353_v14, %v352_v12  ;;  %v361_v17 = vadd.f32 %v360_v15, %v359_v13 }
  0xc4   : > { %v355_v20 = vrot.slane %v354_v16, 2  ;;  %v362_v21 = vrot.slane %v361_v17, 2 }
  0xc6   : > { %v356_v25 = vadd.f32 %v355_v20, %v354_v16  ;;  %v363_v27 = vadd.f32 %v362_v21, %v361_v17 }
  0xc8   : > { %v357_v30 = vrot.slane %v356_v25, 1  ;;  %v364_v31 = vrot.slane %v363_v27, 1 }
  0xca   : > { %v358_v33 = vadd.f32 %v357_v30, %v356_v25  ;;  %v365_v34 = vadd.f32 %v364_v31, %v363_v27 }
  0xcc   : > { %v366_v37 = vmul.f32 %v358_v33, %v338_v3  ;;  %v367_v38 = vmul.f32 %v365_v34, %v339_v4 }
  0xce   : > { %v374_v39 = vmul.f32 %v372_v35, %v366_v37  ;;  %v375_v40 = vmul.f32 %v373_v36, %v367_v38 }
  0xd0   : > { %v379_v42 = vcombine.low %v374_v39, %v375_v40 }
  0xd2   : > { %v386_v43 = vrot.slane %v379_v42, %v385_v41 }
  0xd4   : > { %v393_v45 = vrot.slane %v386_v43, %v385_v41 }
  0xd6   : > { %v395_v46 = vadd.f32 %v393_v45, %v376_v44 }
  0xd8   : > { %400 = vst.msk [vmem:[#allocation5] sm:$0x3] %vm398_vm4, %v395_v46 }
  0xd9   : > { %630 = shalt.err (!%p627_p3)
}
  0xda   : > { %s631_s18 = scalar_lea.hbm %s914_s3, 32 }
  0xdb   : > { %p632_p4 = scmp.ne.s32.totalorder %s914_s3, %s631_s18  ;;  %p637_p13 = scmp.lt.u32.totalorder %s631_s18, %s914_s3 }
  0xdd   : > { %p633_p1 = pnand %p632_p4, %p867_p7 }
  0xdf   : > { %p634_p5 = pneg %p633_p1 }
  0xe1   : > { %p639_p10 = pnand %p637_p13, %p634_p5 }
  0xe3   : > { %642 = shalt.err (!%p639_p10)
}
  0xe4   : > { %513 = dma.vmem_to_hbm [thread:$0]  (%p867_p7), %s412_s9, 32, %s914_s3, [#allocation4]  }
  0xe5   : > { %672 = dma.done.wait (%p867_p7), [#allocation4], 32  }
  0xe6   : > { %674 = vsyncadd (%p867_p7), [#allocation4], 4294967264 }
  0xe7 PF: > { %s17_s17 = sadd.s32 1, %s697_s17   ;;  %s921_s12 = smov %s681_s13 }
  0xe8   : > { %p14_p9 = scmp.ge.s32.totalorder %s17_s17, 4   ;;  %s922_s13 = smov %s685_s14 }
  0xe9   : > { %s923_s14 = smov %s775_s24  ;;  %s924_s15 = smov %s693_s16 }
  0xea   : > { %s925_s16 = smov %s927_s19  ;;  %16 = sbr.rel (!%p14_p9) target bundleno = 5 (0x5), region = 77 }
  0xf1   :  { %424 = vsyncpa [#allocation3], 1 }
  0xf2   :  { %426 = vsyncpa [#allocation3 + $0x1], 1 }
  0xf3   :  { %427 = vsyncpa [#allocation4], 1 }
  0xf4   :  { %429 = vsyncpa [#allocation4 + $0x1], 1 }

</bundles_post_ra>
